<compile_context>
chip_gen: v7x
topology: tpu7x:2x2x1
jax: 0.10.0
libtpu: 0.0.40
codegen_flags: <defaults>
</compile_context>

<pallas_src>
import numpy as np
import jax
import jax.numpy as jnp
from jax.experimental import pallas as pl
from jax.experimental.pallas import tpu as pltpu


def _cdiv(a: int, b: int) -> int:
    return -(-a // b)


def _round_up(v: int, m: int) -> int:
    return _cdiv(v, m) * m


# ------------------------- fused BCE + stats kernel ------------------------- #
def _bce_stats_kernel(x_ref, t_ref, negloss_ref, statsf_ref, statsi_ref,
                      possum_acc, count_acc):
    r = pl.program_id(1)                      # row-tile index ("arbitrary" axis)

    @pl.when(r == 0)
    def _init():                              # fresh accumulators per batch elem
        possum_acc[0] = jnp.float32(0.0)
        count_acc[0] = jnp.int32(0)
        count_acc[1] = jnp.int32(0)

    x = x_ref[...]                            # (1, TR, 128) f32
    t = t_ref[...]

    # Numerically-stable BCE with logits: max(x,0) - x*t + log1p(exp(-|x|)).
    # log1p is expressed with a where() so only exp/log (guaranteed Mosaic
    # lowerings) are needed; the tiny-argument branch keeps precision when
    # |x| is large.
    # NOTE(v6e/v7x): the exp/log could be done in bf16 to halve EUP work; kept
    # in f32 here to preserve reference-level accuracy.
    e = jnp.exp(-jnp.abs(x))
    softplus = jnp.where(e < 1e-5, e, jnp.log(1.0 + e))
    loss = jnp.maximum(x, 0.0) - x * t + softplus

    pos_mask = t == 1.0
    neg_mask = t == 0.0                       # padded pixels carry t == 2.0

    # Lane-dense negative-only loss map; everything else -> -inf so a
    # descending sort pushes it to the tail.
    negloss_ref[...] = jnp.where(neg_mask, loss, -jnp.inf).astype(jnp.float32)

    # Per-tile partial reductions. The f32 reduces are exact (a tile has far
    # fewer than 2^24 elements); cross-tile count accumulation is int32.
    possum_acc[0] += jnp.sum(jnp.where(pos_mask, loss, 0.0))
    count_acc[0] += jnp.sum(pos_mask.astype(jnp.float32)).astype(jnp.int32)
    count_acc[1] += jnp.sum(neg_mask.astype(jnp.float32)).astype(jnp.int32)

    @pl.when(r == pl.num_programs(1) - 1)
    def _finalize():
        lane = jax.lax.broadcasted_iota(jnp.int32, statsi_ref.shape, 2)
        statsf_ref[...] = jnp.full(statsf_ref.shape, possum_acc[0], jnp.float32)
        statsi_ref[...] = (jnp.where(lane == 0, count_acc[0], 0)
                           + jnp.where(lane == 1, count_acc[1], 0))


# ---------------------------------- wrapper --------------------------------- #
@jax.jit
def topk_ce(x, target):
    # NOTE(v5e): if logits/targets are available in bf16 upstream, pass them in
    # bf16 and cast inside the kernel to halve HBM read traffic.
    x = x.astype(jnp.float32)
    t = target.astype(jnp.float32)
    B, C, H, W = x.shape
    N = C * H * W
    LANES = 128

    # Lane-dense tiling: rows of 128 lanes, <=1024 rows per block
    # (1024*128*4 B = 512 KiB per array per block; x + t + negloss double
    # buffered ~3 MiB).
    R = _cdiv(N, LANES)
    MAX_TR = 1024
    n_tiles = _cdiv(R, MAX_TR)
    TR = _round_up(_cdiv(R, n_tiles), 8)          # sublane multiple
    R_pad = TR * n_tiles
    N_pad = R_pad * LANES

    xf = x.reshape(B, N)
    tf = t.reshape(B, N)
    if N_pad != N:
        # Pad target with a sentinel outside {0, 1}: padded pixels belong to
        # neither the positive nor the negative set.
        xf = jnp.pad(xf, ((0, 0), (0, N_pad - N)))
        tf = jnp.pad(tf, ((0, 0), (0, N_pad - N)), constant_values=2.0)
    x3 = xf.reshape(B, R_pad, LANES)
    t3 = tf.reshape(B, R_pad, LANES)

    negloss, stats_f, stats_i = pl.pallas_call(
        _bce_stats_kernel,
        out_shape=(
            jax.ShapeDtypeStruct((B, R_pad, LANES), jnp.float32),   # neg losses
            jax.ShapeDtypeStruct((B, 1, LANES), jnp.float32),       # pos-loss sum
            jax.ShapeDtypeStruct((B, 1, LANES), jnp.int32),         # (#pos, #neg)
        ),
        grid_spec=pltpu.PrefetchScalarGridSpec(
            num_scalar_prefetch=0,
            grid=(B, n_tiles),
            in_specs=[
                pl.BlockSpec((1, TR, LANES), lambda b, r: (b, r, 0)),
                pl.BlockSpec((1, TR, LANES), lambda b, r: (b, r, 0)),
            ],
            out_specs=[
                pl.BlockSpec((1, TR, LANES), lambda b, r: (b, r, 0)),
                pl.BlockSpec((1, 1, LANES), lambda b, r: (b, 0, 0)),
                pl.BlockSpec((1, 1, LANES), lambda b, r: (b, 0, 0)),
            ],
            scratch_shapes=[
                pltpu.SMEM((1,), jnp.float32),   # running sum of positive losses
                pltpu.SMEM((2,), jnp.int32),     # running (#pos, #neg) counts
            ],
        ),
        compiler_params=pltpu.CompilerParams(
            dimension_semantics=("parallel", "arbitrary")),
    )(x3, t3)

    pos_sum = stats_f[:, 0, 0]
    n_white = stats_i[:, 0, 0]
    n_neg = stats_i[:, 0, 1]

    # TODO(synk): exact dynamic-k hard-negative selection stays in XLA glue.
    sorted_desc = -jnp.sort(-negloss.reshape(B, N_pad), axis=-1)

    k_eff = jnp.minimum(3 * n_white, n_neg)                  # per-batch top-k
    idx = jax.lax.broadcasted_iota(jnp.int32, (B, N_pad), 1)
    topk_sum = jnp.sum(jnp.where(idx < k_eff[:, None], sorted_desc, 0.0),
                       axis=-1)

    total_sum = jnp.sum(pos_sum + topk_sum)
    total_cnt = jnp.sum(n_white + k_eff).astype(jnp.float32)
    return total_sum / total_cnt


# ------------------------- pure-numpy reference ------------------------------ #
def ref_topk_ce(x, t):
    x = np.asarray(x, np.float64)
    t = np.asarray(t, np.float64)
    loss = np.maximum(x, 0.0) - x * t + np.log1p(np.exp(-np.abs(x)))
    pieces = []
    for i in range(x.shape[0]):
        li, ti = loss[i], t[i]
        lw = li[ti == 1]
        lb = np.sort(li[ti == 0])[::-1]
        pieces.append(lw)
        pieces.append(lb[: 3 * len(lw)])
    return float(np.mean(np.concatenate(pieces)))


if __name__ == "__main__":
    key = jax.random.PRNGKey(0)
    kx, kt = jax.random.split(key)
    B, C, H, W = 2, 4, 16, 16
    x = jax.random.normal(kx, (B, C, H, W), dtype=jnp.float32)
    target = jax.random.bernoulli(kt, 0.25, (B, C, H, W)).astype(jnp.float32)

    out = jax.block_until_ready(topk_ce(x, target))
    ref = ref_topk_ce(np.asarray(x), np.asarray(target))

    assert np.isfinite(float(out))
    np.testing.assert_allclose(float(out), ref, rtol=1e-4, atol=1e-5)
    print("KERNEL_OK")
</pallas_src>

<mosaic_0001>
module attributes {stable_mosaic.version = 11 : i64} {
  func.func @_bce_stats_kernel(%arg0: i32, %arg1: i32, %arg2: memref<1x8x128xf32, #tpu.memory_space<vmem>>, %arg3: memref<1x8x128xf32, #tpu.memory_space<vmem>>, %arg4: memref<1x8x128xf32, #tpu.memory_space<vmem>>, %arg5: memref<1x1x128xf32, #tpu.memory_space<vmem>>, %arg6: memref<1x1x128xi32, #tpu.memory_space<vmem>>, %arg7: memref<1xf32, #tpu.memory_space<smem>>, %arg8: memref<2xi32, #tpu.memory_space<smem>>) attributes {dimension_semantics = [#tpu.dimension_semantics<parallel>, #tpu.dimension_semantics<arbitrary>], iteration_bounds = array<i64: 2, 1>, scalar_prefetch = 0 : i64, scratch_operands = 2 : i64, tpu.core_type = #tpu.core_type<tc>, window_params = [{transform_indices = @transform_0, window_bounds = array<i64: 1, 8, 128>}, {transform_indices = @transform_1, window_bounds = array<i64: 1, 8, 128>}, {transform_indices = @transform_2, window_bounds = array<i64: 1, 8, 128>}, {transform_indices = @transform_3, window_bounds = array<i64: 1, 1, 128>}, {transform_indices = @transform_4, window_bounds = array<i64: 1, 1, 128>}]} {
    %c0_i32 = arith.constant 0 : i32
    %0 = arith.cmpi eq, %arg1, %c0_i32 : i32
    %1 = arith.extui %0 : i1 to i32
    %c0_i32_0 = arith.constant 0 : i32
    %2 = arith.cmpi ne, %1, %c0_i32_0 : i32
    scf.if %2 {
      %cst_26 = arith.constant 0.000000e+00 : f32
      %c0_27 = arith.constant 0 : index
      %59 = memref.load %arg7[%c0_27] : memref<1xf32, #tpu.memory_space<smem>>
      memref.store %cst_26, %arg7[%c0_27] : memref<1xf32, #tpu.memory_space<smem>>
      %c0_i32_28 = arith.constant 0 : i32
      %c0_29 = arith.constant 0 : index
      %60 = memref.load %arg8[%c0_29] : memref<2xi32, #tpu.memory_space<smem>>
      memref.store %c0_i32_28, %arg8[%c0_29] : memref<2xi32, #tpu.memory_space<smem>>
      %c0_i32_30 = arith.constant 0 : i32
      %c1_31 = arith.constant 1 : index
      %61 = memref.load %arg8[%c1_31] : memref<2xi32, #tpu.memory_space<smem>>
      memref.store %c0_i32_30, %arg8[%c1_31] : memref<2xi32, #tpu.memory_space<smem>>
    } else {
    }
    %c0 = arith.constant 0 : index
    %c0_1 = arith.constant 0 : index
    %c0_2 = arith.constant 0 : index
    %3 = vector.load %arg2[%c0, %c0_1, %c0_2] : memref<1x8x128xf32, #tpu.memory_space<vmem>>, vector<1x8x128xf32>
    %c0_3 = arith.constant 0 : index
    %c0_4 = arith.constant 0 : index
    %c0_5 = arith.constant 0 : index
    %4 = vector.load %arg3[%c0_3, %c0_4, %c0_5] : memref<1x8x128xf32, #tpu.memory_space<vmem>>, vector<1x8x128xf32>
    %5 = math.absf %3 : vector<1x8x128xf32>
    %cst = arith.constant 0.000000e+00 : f32
    %6 = vector.broadcast %cst : f32 to vector<1x8x128xf32>
    %7 = arith.subf %6, %5 : vector<1x8x128xf32>
    %8 = math.exp %7 : vector<1x8x128xf32>
    %cst_6 = arith.constant 9.99999974E-6 : f32
    %9 = vector.broadcast %cst_6 : f32 to vector<1x8x128xf32>
    %10 = arith.cmpf olt, %8, %9 : vector<1x8x128xf32>
    %cst_7 = arith.constant 1.000000e+00 : f32
    %11 = vector.broadcast %cst_7 : f32 to vector<1x8x128xf32>
    %12 = arith.addf %11, %8 : vector<1x8x128xf32>
    %13 = math.log %12 : vector<1x8x128xf32>
    %14 = arith.select %10, %8, %13 : vector<1x8x128xi1>, vector<1x8x128xf32>
    %cst_8 = arith.constant 0.000000e+00 : f32
    %15 = vector.broadcast %cst_8 : f32 to vector<1x8x128xf32>
    %16 = arith.maximumf %3, %15 : vector<1x8x128xf32>
    %17 = arith.mulf %3, %4 : vector<1x8x128xf32>
    %18 = arith.subf %16, %17 : vector<1x8x128xf32>
    %19 = arith.addf %18, %14 : vector<1x8x128xf32>
    %cst_9 = arith.constant 1.000000e+00 : f32
    %20 = vector.broadcast %cst_9 : f32 to vector<1x8x128xf32>
    %21 = arith.cmpf oeq, %4, %20 : vector<1x8x128xf32>
    %cst_10 = arith.constant 0.000000e+00 : f32
    %22 = vector.broadcast %cst_10 : f32 to vector<1x8x128xf32>
    %23 = arith.cmpf oeq, %4, %22 : vector<1x8x128xf32>
    %cst_11 = arith.constant 0xFF800000 : f32
    %24 = vector.broadcast %cst_11 : f32 to vector<1x8x128xf32>
    %25 = arith.select %23, %19, %24 : vector<1x8x128xi1>, vector<1x8x128xf32>
    %c0_12 = arith.constant 0 : index
    %c0_13 = arith.constant 0 : index
    %c0_14 = arith.constant 0 : index
    %26 = vector.load %arg4[%c0_12, %c0_13, %c0_14] : memref<1x8x128xf32, #tpu.memory_space<vmem>>, vector<1x8x128xf32>
    tpu.vector_store %arg4[%c0_12, %c0_13, %c0_14], %25 {strides = array<i32>} : memref<1x8x128xf32, #tpu.memory_space<vmem>>, vector<1x8x128xf32>,
    %c0_15 = arith.constant 0 : index
    %27 = memref.load %arg7[%c0_15] : memref<1xf32, #tpu.memory_space<smem>>
    %cst_16 = arith.constant 0.000000e+00 : f32
    %28 = vector.broadcast %cst_16 : f32 to vector<1x8x128xf32>
    %29 = arith.select %21, %19, %28 : vector<1x8x128xi1>, vector<1x8x128xf32>
    %30 = vector.shape_cast %29 : vector<1x8x128xf32> to vector<1x1x8x128xf32>
    %cst_17 = arith.constant dense<0.000000e+00> : vector<1xf32>
    %31 = vector.multi_reduction <add>, %30, %cst_17 [1, 2, 3] : vector<1x1x8x128xf32> to vector<1xf32>
    %32 = vector.shape_cast %31 : vector<1xf32> to vector<1x1x1x1xf32>
    %33 = vector.extract %32[0, 0, 0, 0] : f32 from vector<1x1x1x1xf32>
    %34 = arith.addf %27, %33 : f32
    %c0_18 = arith.constant 0 : index
    %35 = memref.load %arg7[%c0_18] : memref<1xf32, #tpu.memory_space<smem>>
    memref.store %34, %arg7[%c0_18] : memref<1xf32, #tpu.memory_space<smem>>
    %c0_19 = arith.constant 0 : index
    %36 = memref.load %arg8[%c0_19] : memref<2xi32, #tpu.memory_space<smem>>
    %37 = arith.extui %21 : vector<1x8x128xi1> to vector<1x8x128xi32>
    %38 = arith.sitofp %37 : vector<1x8x128xi32> to vector<1x8x128xf32>
    %39 = vector.shape_cast %38 : vector<1x8x128xf32> to vector<1x1x8x128xf32>
    %cst_20 = arith.constant dense<0.000000e+00> : vector<1xf32>
    %40 = vector.multi_reduction <add>, %39, %cst_20 [1, 2, 3] : vector<1x1x8x128xf32> to vector<1xf32>
    %41 = vector.shape_cast %40 : vector<1xf32> to vector<1x1x1x1xf32>
    %42 = vector.extract %41[0, 0, 0, 0] : f32 from vector<1x1x1x1xf32>
    %43 = arith.fptosi %42 : f32 to i32
    %44 = arith.addi %36, %43 : i32
    %c0_21 = arith.constant 0 : index
    %45 = memref.load %arg8[%c0_21] : memref<2xi32, #tpu.memory_space<smem>>
    memref.store %44, %arg8[%c0_21] : memref<2xi32, #tpu.memory_space<smem>>
    %c1 = arith.constant 1 : index
    %46 = memref.load %arg8[%c1] : memref<2xi32, #tpu.memory_space<smem>>
    %47 = arith.extui %23 : vector<1x8x128xi1> to vector<1x8x128xi32>
    %48 = arith.sitofp %47 : vector<1x8x128xi32> to vector<1x8x128xf32>
    %49 = vector.shape_cast %48 : vector<1x8x128xf32> to vector<1x1x8x128xf32>
    %cst_22 = arith.constant dense<0.000000e+00> : vector<1xf32>
    %50 = vector.multi_reduction <add>, %49, %cst_22 [1, 2, 3] : vector<1x1x8x128xf32> to vector<1xf32>
    %51 = vector.shape_cast %50 : vector<1xf32> to vector<1x1x1x1xf32>
    %52 = vector.extract %51[0, 0, 0, 0] : f32 from vector<1x1x1x1xf32>
    %53 = arith.fptosi %52 : f32 to i32
    %54 = arith.addi %46, %53 : i32
    %c1_23 = arith.constant 1 : index
    %55 = memref.load %arg8[%c1_23] : memref<2xi32, #tpu.memory_space<smem>>
    memref.store %54, %arg8[%c1_23] : memref<2xi32, #tpu.memory_space<smem>>
    %c0_i32_24 = arith.constant 0 : i32
    %56 = arith.cmpi eq, %arg1, %c0_i32_24 : i32
    %57 = arith.extui %56 : i1 to i32
    %c0_i32_25 = arith.constant 0 : i32
    %58 = arith.cmpi ne, %57, %c0_i32_25 : i32
    scf.if %58 {
      %59 = tpu.iota {dimensions = array<i32: 2>} : vector<1x1x128xi32>
      %c0_26 = arith.constant 0 : index
      %60 = memref.load %arg7[%c0_26] : memref<1xf32, #tpu.memory_space<smem>>
      %61 = vector.broadcast %60 : f32 to vector<1x1x128xf32>
      %c0_27 = arith.constant 0 : index
      %c0_28 = arith.constant 0 : index
      %c0_29 = arith.constant 0 : index
      %62 = vector.load %arg5[%c0_27, %c0_28, %c0_29] : memref<1x1x128xf32, #tpu.memory_space<vmem>>, vector<1x1x128xf32>
      tpu.vector_store %arg5[%c0_27, %c0_28, %c0_29], %61 {strides = array<i32>} : memref<1x1x128xf32, #tpu.memory_space<vmem>>, vector<1x1x128xf32>,
      %c0_i32_30 = arith.constant 0 : i32
      %63 = vector.broadcast %c0_i32_30 : i32 to vector<1x1x128xi32>
      %64 = arith.cmpi eq, %59, %63 : vector<1x1x128xi32>
      %c0_31 = arith.constant 0 : index
      %65 = memref.load %arg8[%c0_31] : memref<2xi32, #tpu.memory_space<smem>>
      %c0_i32_32 = arith.constant 0 : i32
      %66 = vector.broadcast %65 : i32 to vector<1x1x128xi32>
      %67 = vector.broadcast %c0_i32_32 : i32 to vector<1x1x128xi32>
      %68 = arith.select %64, %66, %67 : vector<1x1x128xi1>, vector<1x1x128xi32>
      %c1_i32 = arith.constant 1 : i32
      %69 = vector.broadcast %c1_i32 : i32 to vector<1x1x128xi32>
      %70 = arith.cmpi eq, %59, %69 : vector<1x1x128xi32>
      %c1_33 = arith.constant 1 : index
      %71 = memref.load %arg8[%c1_33] : memref<2xi32, #tpu.memory_space<smem>>
      %c0_i32_34 = arith.constant 0 : i32
      %72 = vector.broadcast %71 : i32 to vector<1x1x128xi32>
      %73 = vector.broadcast %c0_i32_34 : i32 to vector<1x1x128xi32>
      %74 = arith.select %70, %72, %73 : vector<1x1x128xi1>, vector<1x1x128xi32>
      %75 = arith.addi %68, %74 : vector<1x1x128xi32>
      %c0_35 = arith.constant 0 : index
      %c0_36 = arith.constant 0 : index
      %c0_37 = arith.constant 0 : index
      %76 = vector.load %arg6[%c0_35, %c0_36, %c0_37] : memref<1x1x128xi32, #tpu.memory_space<vmem>>, vector<1x1x128xi32>
      tpu.vector_store %arg6[%c0_35, %c0_36, %c0_37], %75 {strides = array<i32>} : memref<1x1x128xi32, #tpu.memory_space<vmem>>, vector<1x1x128xi32>,
    } else {
    }
    return
  }
  func.func @transform_0(%arg0: i32, %arg1: i32) -> (i32, i32, i32) {
    %c0_i32 = arith.constant 0 : i32
    %c0_i32_0 = arith.constant 0 : i32
    return %arg0, %arg1, %c0_i32 : i32, i32, i32
  }
  func.func @transform_1(%arg0: i32, %arg1: i32) -> (i32, i32, i32) {
    %c0_i32 = arith.constant 0 : i32
    %c0_i32_0 = arith.constant 0 : i32
    return %arg0, %arg1, %c0_i32 : i32, i32, i32
  }
  func.func @transform_2(%arg0: i32, %arg1: i32) -> (i32, i32, i32) {
    %c0_i32 = arith.constant 0 : i32
    %c0_i32_0 = arith.constant 0 : i32
    return %arg0, %arg1, %c0_i32 : i32, i32, i32
  }
  func.func @transform_3(%arg0: i32, %arg1: i32) -> (i32, i32, i32) {
    %c0_i32 = arith.constant 0 : i32
    %c0_i32_0 = arith.constant 0 : i32
    %c0_i32_1 = arith.constant 0 : i32
    return %arg0, %c0_i32, %c0_i32_0 : i32, i32, i32
  }
  func.func @transform_4(%arg0: i32, %arg1: i32) -> (i32, i32, i32) {
    %c0_i32 = arith.constant 0 : i32
    %c0_i32_0 = arith.constant 0 : i32
    %c0_i32_1 = arith.constant 0 : i32
    return %arg0, %c0_i32, %c0_i32_0 : i32, i32, i32
  }
}

</mosaic_0001>

<bundles_post_ra>
// kernel: topk_ce.1
= control target key start
LH: loop header
LB: loop body
LE: loop exit
PB: predicated region body
PF: predicated region fallthrough
CT: control target
= control target key end

     0   :  { %s610_s15 = smov 0   ;;  %s612_s16 = smov 0   ;;  %s659_s0 = inlined_call_operand.vmem [shape: f32[2,8,128], index: 0, kind: input, shape index: {}]   ;;  %s660_s1 = inlined_call_operand.vmem [shape: f32[2,8,128], index: 1, kind: input, shape index: {}]   ;;  %s661_s2 = inlined_call_operand.vmem [shape: f32[2,8,128], index: 2, kind: output, shape index: {0}]   ;;  %s662_s3 = inlined_call_operand.vmem [shape: f32[2,1,128], index: 3, kind: output, shape index: {1}]   ;;  %s663_s4 = inlined_call_operand.vmem [shape: s32[2,1,128], index: 4, kind: output, shape index: {2}]  }
   0x1   :  { %s614_s17 = smov 0  }
   0x2 LB: > { %s27_s18 = sadd.s32 1, %s578_s16  ;;  %p505_p0 = scmp.ge.s32.totalorder %s582_s17, 1  ;;  %s582_s17 = sphi %s614_s17, %s15_s17   ;;  %s578_s16 = sphi %s612_s16, %s665_s16   ;;  %s574_s15 = sphi %s610_s15, %s664_s15  }
   0x3   : > { %p29_p1 = scmp.ge.s32.totalorder %s27_s18, 2  ;;  %p199_p2 = scmp.lt.s32.totalorder %s582_s17, 3 }
   0x5   : > { %s667_s18 = smov (%p29_p1, %s27_s18), 0  ;;  %p200_p3 = pnand %p505_p0, %p199_p2 }
   0x6   : > { %p242_p4 = scmp.lt.s32.totalorder (!%p200_p3), %s574_s15, 1  ;;  %v584_v2 = vmov (!%p200_p3), 0.0   ;;  %v347_v41 = vlaneseq (!%p200_p3) }
   0x7   : > { %203 = sbr.rel (%p200_p3) target bundleno = 276 (0x114), region = 28 }
   0x8   : > { %v348_v42 = vand.u32 (!%p200_p3), 127, %v347_v41 }
   0xa   : > { %vm352_vm3 = vcmp.eq.s32.totalorder (!%p200_p3), %v348_v42, 0  ;;  %vm356_vm4 = vcmp.eq.s32.totalorder (!%p200_p3), %v348_v42, 1 }
   0xe   : > { %s669_s15 = smov (!%p242_p4, %s574_s15), 1 }
   0xf   : > { %s506_s19 = sshll.u32 %s669_s15, 3  ;;  %s265_s5 = scalar_lea.vmem %s662_s3, %s669_s15 }
  0x10   : > { %s255_s22 = scalar_lea.vmem %s660_s1, %s506_s19  ;;  %s248_s25 = scalar_lea.vmem %s659_s0, %s506_s19 }
  0x11   : > { %v280_v0 = vld [vmem:[%s255_s22] sm:$0xff]  ;;  %s262_s28 = scalar_lea.vmem %s661_s2, %s506_s19  ;;  %s268_s21 = scalar_lea.vmem %s663_s4, %s669_s15 }
  0x12   : > { %vm295_vm0 = vcmp.eq.f32.partialorder %v280_v0, 0.0  ;;  %v279_v1 = vld [vmem:[%s248_s25] sm:$0xff]  ;;  %vm294_vm2 = vcmp.eq.f32.partialorder %v280_v0, 1.0 }
  0x13   : > { %v511_v3 = vsel %vm295_vm0, 1.0, %v584_v2  ;;  %v281_v4 = vand.u32 2147483647, %v279_v1  ;;  %v290_v9 = vmax.f32 %v279_v1, 0.0  ;;  %v291_v10 = vmul.f32 %v280_v0, %v279_v1 }
  0x14   : > { %331 = vadd.xlane.f32.xlu1 %v511_v3  ;;  %v509_v18 = vsel %vm294_vm2, 1.0, %v584_v2 }
  0x15   : > { %v282_v5 = vsub.f32 0.0, %v281_v4  ;;  %v292_v12 = vsub.f32 %v290_v9, %v291_v10 }
  0x17   : > { %v283_v6 = vmul.f32 1.442695, %v282_v5 }
  0x19   : > { %556 = vpow2.f32 %v283_v6 }
  0x23   : > { %v557_v7 = vpop.eup %556 }
  0x24   : > { %v286_v8 = vadd.f32 1.0, %v557_v7  ;;  %vm285_vm1 = vcmp.lt.f32.partialorder %v557_v7, 1e-05 }
  0x26   : > { %558 = vlog2.f32 %v286_v8 }
  0x30   : > { %v559_v11 = vpop.eup %558 }
  0x31   : > { %v288_v13 = vmul.f32 0.6931472, %v559_v11 }
  0x33   : > { %v289_v14 = vsel %vm285_vm1, %v557_v7, %v288_v13 }
  0x34   : > { %v293_v15 = vadd.f32 %v292_v12, %v289_v14 }
  0x36   : > { %v296_v16 = vsel %vm295_vm0, %v293_v15, -inf  ;;  %v299_v17 = vsel %vm294_vm2, %v293_v15, 0.0 }
  0x37   : > { %297 = vst [vmem:[%s262_s28] sm:$0xff] %v296_v16  ;;  %300 = vadd.xlane.f32.xlu0 %v299_v17 }
  0x3b   : > { %315 = vadd.xlane.f32.xlu0 %v509_v18 }
  0xa1   : > { %v332_v19 = vpop.xlane.xlu1 %331 }
  0xa2   : > { %v333_v20 = vrot.slane %v332_v19, 4 }
  0xa4   : > { %v334_v21 = vadd.f32 %v333_v20, %v332_v19 }
  0xa6   : > { %v335_v25 = vrot.slane %v334_v21, 2 }
  0xa8   : > { %v336_v31 = vadd.f32 %v335_v25, %v334_v21 }
  0xaa   : > { %v337_v36 = vrot.slane %v336_v31, 1 }
  0xac   : > { %v338_v39 = vadd.f32 %v337_v36, %v336_v31 }
  0xc4   : > { %v301_v22 = vpop.xlane.xlu0 %300 }
  0xc5   : > { %v302_v23 = vrot.slane %v301_v22, 4 }
  0xc7   : > { %v303_v24 = vadd.f32 %v302_v23, %v301_v22 }
  0xc8   : > { %v316_v26 = vpop.xlane.xlu0 %315 }
  0xc9   : > { %v304_v27 = vrot.slane %v303_v24, 2  ;;  %v317_v28 = vrot.slane %v316_v26, 4 }
  0xcb   : > { %v318_v29 = vadd.f32 %v317_v28, %v316_v26  ;;  %v305_v30 = vadd.f32 %v304_v27, %v303_v24 }
  0xcd   : > { %v319_v32 = vrot.slane %v318_v29, 2  ;;  %v306_v33 = vrot.slane %v305_v30, 1 }
  0xcf   : > { %v320_v34 = vadd.f32 %v319_v32, %v318_v29  ;;  %v307_v35 = vadd.f32 %v306_v33, %v305_v30 }
  0xd1   : > { %515 = vpush %v307_v35  ;;  %v321_v37 = vrot.slane %v320_v34, 1 }
  0xd3   : > { %v322_v38 = vadd.f32 %v321_v37, %v320_v34 }
  0xd5   : > { %517 = vpush %v322_v38 }
  0xd6   : > { %524 = vpush %v338_v39 }
 0x102   : > { %s516_s6 = spop %515 }
 0x103   : > { %v350_v40 = vstv %s516_s6 }
 0x104   : > { %351 = vst [vmem:[%s265_s5] sm:$0x1] %v350_v40 }
 0x106   : > { %s518_s7 = spop %517 }
 0x107   : > { %p519_p5 = scmp.lt.s32.totalorder %s518_s7, 0  ;;  %s520_s8 = sceil.f32 %s518_s7 }
 0x108   : > { %s521_s9 = sfloor.f32 %s518_s7  ;;  %s525_s10 = spop %524 }
 0x109   : > { %s671_s8 = smov (!%p519_p5, %s520_s8), %s521_s9  ;;  %p526_p6 = scmp.lt.s32.totalorder %s525_s10, 0 }
 0x10a   : > { %s527_s11 = sceil.f32 %s525_s10  ;;  %s523_s12 = scvt.f32.s32 %s671_s8 }
 0x10b   : > { %s528_s13 = sfloor.f32 %s525_s10 }
 0x10c   : > { %s673_s11 = smov (!%p526_p6, %s527_s11), %s528_s13  ;;  %v354_v43 = vstv %s523_s12 }
 0x10d   : > { %s530_s14 = scvt.f32.s32 %s673_s11  ;;  %v355_v44 = vsel %vm352_vm3, %v354_v43, 0 }
 0x10f   : > { %v358_v45 = vstv %s530_s14 }
 0x110   : > { %v359_v46 = vsel %vm356_vm4, %v358_v45, 0 }
 0x111   : > { %v360_v47 = vadd.s32 %v359_v46, %v355_v44 }
 0x113   : > { %361 = vst [vmem:[%s268_s21] sm:$0x1] %v360_v47 }
 0x114 PF: > { %s15_s17 = sadd.s32 1, %s582_s17   ;;  %s664_s15 = smov %s578_s16 }
 0x115   : > { %p12_p7 = scmp.ge.s32.totalorder %s15_s17, 4   ;;  %s665_s16 = smov %s667_s18 }
 0x117   :  { %14 = sbr.rel (!%p12_p7) target bundleno = 2 (0x2), region = 99 }

</bundles_post_ra>
